<compile_context>
chip_gen: v7x
topology: tpu7x:2x2x1
jax: 0.10.0
libtpu: 0.0.40
codegen_flags: <defaults>
</compile_context>

<pallas_src>
import jax
import jax.numpy as jnp
from jax.experimental import pallas as pl
from jax.experimental.pallas import tpu as pltpu

LANE = 128
TR_MIN = 256                 # smallest row block when splitting (keeps per-step DMA >~1 MiB)
TR_MAX = 2048                # largest row block; ~18.5 MiB double-buffered across the 10 arrays
TARGET_STEPS = 8             # aim for >= 8 grid steps: pipelining + both v7x TensorCores
VMEM_LIMIT_BYTES = 40 * 1024 * 1024   # > footprint at TR_MAX, < v7x's 64 MiB physical VMEM


def _elementwise_kernel(x0_ref, x1_ref, x2_ref, x3_ref, x4_ref,
                        add_ref, sub_ref, mul_ref, div_ref, cmp_ref):
    x0 = x0_ref[...]
    x1 = x1_ref[...]
    x2 = x2_ref[...]
    x3 = x3_ref[...]
    x4 = x4_ref[...]

    add_ref[...] = x0 + x1
    sub_ref[...] = x2 - x3
    mul_ref[...] = x1 * x4
    div_ref[...] = x4 / (x2 + jnp.float32(1e-06))
    # comparison stored as int8 0/1; converted to bool by the wrapper
    cmp_ref[...] = (x0 > x1).astype(jnp.int8)


def _round_up(x, m):
    return ((x + m - 1) // m) * m


def _choose_tr(rows):
    """Pick the row-block size.

    Invariants:
      * tr == rows (single full-array block) only for tiny inputs (rows <= TR_MIN);
        legality there comes from block_shape == full array dims, regardless of
        8/32-row alignment.
      * when splitting, tr is a multiple of 32 (int8 cmp output tiling) and the
        grid has >= 2 steps (>= TARGET_STEPS once the input is large enough).
    """
    if rows <= TR_MIN:
        return rows
    tr = _round_up(-(-rows // TARGET_STEPS), 32)
    return max(TR_MIN, min(tr, TR_MAX))


@jax.jit
def _forward(x0, x1, x2, x3, x4):
    orig_shape = x0.shape
    n = x0.size

    # Lane padding only (numel -> multiple of 128).  Rows are NOT padded to a
    # block multiple: the ragged last row-block is handled by Pallas partial-block
    # masking, so the aligned (common NCHW) path does zero extra copies.
    n_pad = _round_up(n, LANE)
    needs_lane_pad = n_pad != n
    rows = n_pad // LANE

    def prep(a):
        flat = a.reshape(-1).astype(jnp.float32)
        if needs_lane_pad:
            # TODO(synk): this pad (and the matching output slice) materializes a
            # copy; it is only taken when numel is not a multiple of 128.
            flat = jnp.pad(flat, (0, n_pad - n))
        return flat.reshape(rows, LANE)

    xs = [prep(a) for a in (x0, x1, x2, x3, x4)]

    tr = _choose_tr(rows)
    grid = (pl.cdiv(rows, tr),)
    blk = pl.BlockSpec((tr, LANE), lambda i: (i, 0))

    out_shapes = (
        jax.ShapeDtypeStruct((rows, LANE), jnp.float32),  # add
        jax.ShapeDtypeStruct((rows, LANE), jnp.float32),  # sub
        jax.ShapeDtypeStruct((rows, LANE), jnp.float32),  # mul
        jax.ShapeDtypeStruct((rows, LANE), jnp.float32),  # div
        jax.ShapeDtypeStruct((rows, LANE), jnp.int8),     # cmp (0/1)
    )

    add_o, sub_o, mul_o, div_o, cmp_o = pl.pallas_call(
        _elementwise_kernel,
        out_shape=out_shapes,
        grid=grid,
        in_specs=[blk, blk, blk, blk, blk],
        out_specs=(blk, blk, blk, blk, blk),
        compiler_params=pltpu.CompilerParams(
            dimension_semantics=("parallel",),
            vmem_limit_bytes=VMEM_LIMIT_BYTES,
        ),
    )(*xs)

    def unprep(a):
        if needs_lane_pad:
            a = a.reshape(-1)[:n]
        return a.reshape(orig_shape)

    add_result = unprep(add_o)
    sub_result = unprep(sub_o)
    mul_result = unprep(mul_o)
    div_result = unprep(div_o)
    comparison_result = unprep(cmp_o) != 0   # int8 -> bool, fused under jit

    return add_result, sub_result, mul_result, div_result, comparison_result


def pt_module_forward(inputs):
    """inputs: tuple/list of 5 float32 arrays, all the same shape (e.g. NCHW)."""
    x0, x1, x2, x3, x4 = inputs
    return _forward(x0, x1, x2, x3, x4)


def _check(inputs):
    outs = jax.block_until_ready(pt_module_forward(inputs))
    x0, x1, x2, x3, x4 = inputs
    ref = (
        x0 + x1,
        x2 - x3,
        x1 * x4,
        x4 / (x2 + 1e-06),
        x0 > x1,
    )
    for got, want in zip(outs, ref):
        assert got.shape == want.shape, (got.shape, want.shape)
        assert got.dtype == want.dtype, (got.dtype, want.dtype)
        if got.dtype == jnp.bool_:
            assert bool(jnp.all(got == want))
        else:
            assert bool(jnp.allclose(got, want, rtol=1e-6, atol=1e-6))


if __name__ == "__main__":
    def make_inputs(seed, shape):
        keys = jax.random.split(jax.random.PRNGKey(seed), 5)
        return tuple(jax.random.normal(k, shape, dtype=jnp.float32) for k in keys)

    # main case: NCHW, tile-aligned, tiny -> single full-array block
    _check(make_inputs(0, (2, 4, 16, 16)))

    # ragged numel: exercises the lane-pad path (numel % 128 != 0)
    _check(make_inputs(1, (2, 3, 17, 19)))

    # mid-size, rows not a multiple of tr: exercises the partial last block
    # (rows = 300, tr = 256 -> grid = 2, masked writes on the 44-row tail)
    _check(make_inputs(2, (2, 4, 48, 100)))

    # larger aligned case: rows = 2048 -> tr = 256 -> 8-step parallel grid
    _check(make_inputs(3, (4, 16, 64, 64)))

    print("KERNEL_OK")
</pallas_src>

<mosaic_0001>
module attributes {stable_mosaic.version = 11 : i64} {
  func.func @_elementwise_kernel(%arg0: i32, %arg1: memref<16x128xf32, #tpu.memory_space<vmem>>, %arg2: memref<16x128xf32, #tpu.memory_space<vmem>>, %arg3: memref<16x128xf32, #tpu.memory_space<vmem>>, %arg4: memref<16x128xf32, #tpu.memory_space<vmem>>, %arg5: memref<16x128xf32, #tpu.memory_space<vmem>>, %arg6: memref<16x128xf32, #tpu.memory_space<vmem>>, %arg7: memref<16x128xf32, #tpu.memory_space<vmem>>, %arg8: memref<16x128xf32, #tpu.memory_space<vmem>>, %arg9: memref<16x128xf32, #tpu.memory_space<vmem>>, %arg10: memref<16x128xi8, #tpu.memory_space<vmem>>) attributes {dimension_semantics = [#tpu.dimension_semantics<parallel>], iteration_bounds = array<i64: 1>, scalar_prefetch = 0 : i64, scratch_operands = 0 : i64, tpu.core_type = #tpu.core_type<tc>, window_params = [{transform_indices = @transform_0, window_bounds = array<i64: 16, 128>}, {transform_indices = @transform_1, window_bounds = array<i64: 16, 128>}, {transform_indices = @transform_2, window_bounds = array<i64: 16, 128>}, {transform_indices = @transform_3, window_bounds = array<i64: 16, 128>}, {transform_indices = @transform_4, window_bounds = array<i64: 16, 128>}, {transform_indices = @transform_5, window_bounds = array<i64: 16, 128>}, {transform_indices = @transform_6, window_bounds = array<i64: 16, 128>}, {transform_indices = @transform_7, window_bounds = array<i64: 16, 128>}, {transform_indices = @transform_8, window_bounds = array<i64: 16, 128>}, {transform_indices = @transform_9, window_bounds = array<i64: 16, 128>}]} {
    %c0 = arith.constant 0 : index
    %c0_0 = arith.constant 0 : index
    %0 = vector.load %arg1[%c0, %c0_0] : memref<16x128xf32, #tpu.memory_space<vmem>>, vector<16x128xf32>
    %c0_1 = arith.constant 0 : index
    %c0_2 = arith.constant 0 : index
    %1 = vector.load %arg2[%c0_1, %c0_2] : memref<16x128xf32, #tpu.memory_space<vmem>>, vector<16x128xf32>
    %c0_3 = arith.constant 0 : index
    %c0_4 = arith.constant 0 : index
    %2 = vector.load %arg3[%c0_3, %c0_4] : memref<16x128xf32, #tpu.memory_space<vmem>>, vector<16x128xf32>
    %c0_5 = arith.constant 0 : index
    %c0_6 = arith.constant 0 : index
    %3 = vector.load %arg4[%c0_5, %c0_6] : memref<16x128xf32, #tpu.memory_space<vmem>>, vector<16x128xf32>
    %c0_7 = arith.constant 0 : index
    %c0_8 = arith.constant 0 : index
    %4 = vector.load %arg5[%c0_7, %c0_8] : memref<16x128xf32, #tpu.memory_space<vmem>>, vector<16x128xf32>
    %5 = arith.addf %0, %1 : vector<16x128xf32>
    %c0_9 = arith.constant 0 : index
    %c0_10 = arith.constant 0 : index
    %6 = vector.load %arg6[%c0_9, %c0_10] : memref<16x128xf32, #tpu.memory_space<vmem>>, vector<16x128xf32>
    tpu.vector_store %arg6[%c0_9, %c0_10], %5 {strides = array<i32>} : memref<16x128xf32, #tpu.memory_space<vmem>>, vector<16x128xf32>,
    %7 = arith.subf %2, %3 : vector<16x128xf32>
    %c0_11 = arith.constant 0 : index
    %c0_12 = arith.constant 0 : index
    %8 = vector.load %arg7[%c0_11, %c0_12] : memref<16x128xf32, #tpu.memory_space<vmem>>, vector<16x128xf32>
    tpu.vector_store %arg7[%c0_11, %c0_12], %7 {strides = array<i32>} : memref<16x128xf32, #tpu.memory_space<vmem>>, vector<16x128xf32>,
    %9 = arith.mulf %1, %4 : vector<16x128xf32>
    %c0_13 = arith.constant 0 : index
    %c0_14 = arith.constant 0 : index
    %10 = vector.load %arg8[%c0_13, %c0_14] : memref<16x128xf32, #tpu.memory_space<vmem>>, vector<16x128xf32>
    tpu.vector_store %arg8[%c0_13, %c0_14], %9 {strides = array<i32>} : memref<16x128xf32, #tpu.memory_space<vmem>>, vector<16x128xf32>,
    %cst = arith.constant 9.99999997E-7 : f32
    %11 = vector.broadcast %cst : f32 to vector<16x128xf32>
    %12 = arith.addf %2, %11 : vector<16x128xf32>
    %13 = arith.divf %4, %12 : vector<16x128xf32>
    %c0_15 = arith.constant 0 : index
    %c0_16 = arith.constant 0 : index
    %14 = vector.load %arg9[%c0_15, %c0_16] : memref<16x128xf32, #tpu.memory_space<vmem>>, vector<16x128xf32>
    tpu.vector_store %arg9[%c0_15, %c0_16], %13 {strides = array<i32>} : memref<16x128xf32, #tpu.memory_space<vmem>>, vector<16x128xf32>,
    %15 = arith.cmpf ogt, %0, %1 : vector<16x128xf32>
    %16 = arith.extui %15 : vector<16x128xi1> to vector<16x128xi8>
    %c0_17 = arith.constant 0 : index
    %c0_18 = arith.constant 0 : index
    %17 = vector.load %arg10[%c0_17, %c0_18] : memref<16x128xi8, #tpu.memory_space<vmem>>, vector<16x128xi8>
    tpu.vector_store %arg10[%c0_17, %c0_18], %16 {strides = array<i32>} : memref<16x128xi8, #tpu.memory_space<vmem>>, vector<16x128xi8>,
    return
  }
  func.func @transform_0(%arg0: i32) -> (i32, i32) {
    %c0_i32 = arith.constant 0 : i32
    %c0_i32_0 = arith.constant 0 : i32
    return %arg0, %c0_i32 : i32, i32
  }
  func.func @transform_1(%arg0: i32) -> (i32, i32) {
    %c0_i32 = arith.constant 0 : i32
    %c0_i32_0 = arith.constant 0 : i32
    return %arg0, %c0_i32 : i32, i32
  }
  func.func @transform_2(%arg0: i32) -> (i32, i32) {
    %c0_i32 = arith.constant 0 : i32
    %c0_i32_0 = arith.constant 0 : i32
    return %arg0, %c0_i32 : i32, i32
  }
  func.func @transform_3(%arg0: i32) -> (i32, i32) {
    %c0_i32 = arith.constant 0 : i32
    %c0_i32_0 = arith.constant 0 : i32
    return %arg0, %c0_i32 : i32, i32
  }
  func.func @transform_4(%arg0: i32) -> (i32, i32) {
    %c0_i32 = arith.constant 0 : i32
    %c0_i32_0 = arith.constant 0 : i32
    return %arg0, %c0_i32 : i32, i32
  }
  func.func @transform_5(%arg0: i32) -> (i32, i32) {
    %c0_i32 = arith.constant 0 : i32
    %c0_i32_0 = arith.constant 0 : i32
    return %arg0, %c0_i32 : i32, i32
  }
  func.func @transform_6(%arg0: i32) -> (i32, i32) {
    %c0_i32 = arith.constant 0 : i32
    %c0_i32_0 = arith.constant 0 : i32
    return %arg0, %c0_i32 : i32, i32
  }
  func.func @transform_7(%arg0: i32) -> (i32, i32) {
    %c0_i32 = arith.constant 0 : i32
    %c0_i32_0 = arith.constant 0 : i32
    return %arg0, %c0_i32 : i32, i32
  }
  func.func @transform_8(%arg0: i32) -> (i32, i32) {
    %c0_i32 = arith.constant 0 : i32
    %c0_i32_0 = arith.constant 0 : i32
    return %arg0, %c0_i32 : i32, i32
  }
  func.func @transform_9(%arg0: i32) -> (i32, i32) {
    %c0_i32 = arith.constant 0 : i32
    %c0_i32_0 = arith.constant 0 : i32
    return %arg0, %c0_i32 : i32, i32
  }
}

</mosaic_0001>

<bundles_post_ra>
// kernel: _forward.1
= control target key start
LH: loop header
LB: loop body
LE: loop exit
PB: predicated region body
PF: predicated region fallthrough
CT: control target
= control target key end

     0   :  { %v95_v18 = vmov 0   ;;  %s206_s0 = inlined_call_operand.vmem [shape: f32[16,128], index: 0, kind: input, shape index: {}]   ;;  %s207_s1 = inlined_call_operand.vmem [shape: f32[16,128], index: 1, kind: input, shape index: {}]   ;;  %s208_s2 = inlined_call_operand.vmem [shape: f32[16,128], index: 2, kind: input, shape index: {}]   ;;  %s209_s3 = inlined_call_operand.vmem [shape: f32[16,128], index: 3, kind: input, shape index: {}]   ;;  %s210_s4 = inlined_call_operand.vmem [shape: f32[16,128], index: 4, kind: input, shape index: {}]   ;;  %s211_s5 = inlined_call_operand.vmem [shape: f32[16,128], index: 5, kind: output, shape index: {0}]   ;;  %s212_s6 = inlined_call_operand.vmem [shape: f32[16,128], index: 6, kind: output, shape index: {1}]   ;;  %s213_s7 = inlined_call_operand.vmem [shape: f32[16,128], index: 7, kind: output, shape index: {2}]   ;;  %s214_s9 = inlined_call_operand.vmem [shape: s8[16,128], index: 9, kind: output, shape index: {4}]   ;;  %s215_s8 = inlined_call_operand.vmem [shape: f32[16,128], index: 8, kind: output, shape index: {3}]  }
   0x1   :  { %v27_v0 = vld [vmem:[%s206_s0] sm:$0xff]  ;;  %v28_v2 = vld [vmem:[%s206_s0 + $0x8] sm:$0xff] }
   0x2   :  { %v29_v1 = vld [vmem:[%s207_s1] sm:$0xff]  ;;  %v30_v4 = vld [vmem:[%s207_s1 + $0x8] sm:$0xff] }
   0x3   :  { %v37_v3 = vadd.f32 %v29_v1, %v27_v0  ;;  %vm57_vm0 = vcmp.gt.f32.partialorder %v27_v0, %v29_v1  ;;  %v31_v5 = vld [vmem:[%s208_s2] sm:$0xff]  ;;  %v38_v7 = vadd.f32 %v30_v4, %v28_v2  ;;  %vm58_vm1 = vcmp.gt.f32.partialorder %v28_v2, %v30_v4  ;;  %v32_v10 = vld [vmem:[%s208_s2 + $0x8] sm:$0xff] }
   0x4   :  { %v33_v6 = vld [vmem:[%s209_s3] sm:$0xff]  ;;  %v49_v9 = vadd.f32 1e-06, %v31_v5  ;;  %v34_v11 = vld [vmem:[%s209_s3 + $0x8] sm:$0xff]  ;;  %vm59_vm2 = vmpackc.low %vm58_vm1, %vm57_vm0  ;;  %v50_v14 = vadd.f32 1e-06, %v32_v10 }
   0x5   :  { %v41_v8 = vsub.f32 %v31_v5, %v33_v6  ;;  %v35_v12 = vld [vmem:[%s210_s4] sm:$0xff]  ;;  %39 = vst [vmem:[%s211_s5] sm:$0xff] %v37_v3  ;;  %v42_v13 = vsub.f32 %v32_v10, %v34_v11  ;;  %v36_v16 = vld [vmem:[%s210_s4 + $0x8] sm:$0xff]  ;;  %40 = vst [vmem:[%s211_s5 + $0x8] sm:$0xff] %v38_v7 }
   0x6   :  { %v45_v15 = vmul.f32 %v35_v12, %v29_v1  ;;  %91 = vrcp.f32 %v49_v9  ;;  %v46_v17 = vmul.f32 %v36_v16, %v30_v4  ;;  %vm60_vm3 = vmpackc.even %vm59_vm2, %vm59_vm2 }
   0x7   :  { %43 = vst [vmem:[%s212_s6] sm:$0xff] %v41_v8  ;;  %44 = vst [vmem:[%s212_s6 + $0x8] sm:$0xff] %v42_v13  ;;  %93 = vrcp.f32 %v50_v14  ;;  %v61_v19 = vsel %vm60_vm3, 16843009, %v95_v18 }
   0x8   :  { %47 = vst [vmem:[%s213_s7] sm:$0xff] %v45_v15  ;;  %48 = vst [vmem:[%s213_s7 + $0x8] sm:$0xff] %v46_v17  ;;  %v62_v20 = vunpack.c.0.s8 %v61_v19  ;;  %v63_v21 = vunpack.c.1.s8 %v61_v19 }
   0xa   :  { %v64_v22 = vpack.c.b16 %v62_v20, %v62_v20  ;;  %v66_v23 = vpack.c.b16 %v63_v21, %v63_v21 }
   0xc   :  { %v65_v24 = vpack.c.b8 %v64_v22, %v64_v22  ;;  %v67_v25 = vpack.c.b8 %v66_v23, %v66_v23 }
   0xe   :  { %68 = vst [vmem:[%s214_s9] sm:$0x3] %v65_v24  ;;  %69 = vst [vmem:[%s214_s9 + $0x2] sm:$0x3] %v67_v25 }
  0x10   :  { %v92_v26 = vpop.eup %91 }
  0x11   :  { %v94_v27 = vpop.eup %93  ;;  %v52_v28 = vmul.f32 %v92_v26, %v35_v12 }
  0x12   :  { %v54_v29 = vmul.f32 %v94_v27, %v36_v16 }
  0x13   :  { %55 = vst [vmem:[%s215_s8] sm:$0xff] %v52_v28 }
  0x14   :  { %56 = vst [vmem:[%s215_s8 + $0x8] sm:$0xff] %v54_v29 }

</bundles_post_ra>
